<compile_context>
chip_gen: v5e
topology: v5e:2x2
jax: 0.10.0
libtpu: 0.0.40
codegen_flags: <defaults>
</compile_context>

<pallas_src>
import functools
import math

import jax
import jax.numpy as jnp
from jax.experimental import pallas as pl
from jax.experimental.pallas import tpu as pltpu

LANE = 128  # TPU lane width; hidden (64) and heads (A+1) are padded up to this


def _round_up(x, m):
    return ((x + m - 1) // m) * m


def policy_kernel(s_ref, w1_ref, wstack_ref, bstack_ref, out_ref, *, action_dim):
    x = s_ref[...]                       # (TB, obs_dim)
    b1 = bstack_ref[0]                   # (H,)
    b2 = bstack_ref[1]
    bh = bstack_ref[2]

    # shared_layer + ReLU   (padded lanes stay exactly 0 through ReLU)
    h1 = jnp.dot(x, w1_ref[...], preferred_element_type=jnp.float32) + b1
    h1 = jnp.maximum(h1, 0.0)
    # shared_layer2 + ReLU
    h2 = jnp.dot(h1, wstack_ref[0], preferred_element_type=jnp.float32) + b2
    h2 = jnp.maximum(h2, 0.0)
    # fused action+value head: one MXU pass, lanes 0..A-1 = logits, lane A = value,
    # lanes A+1.. = 0 (zero-padded weights/bias)
    y = jnp.dot(h2, wstack_ref[1], preferred_element_type=jnp.float32) + bh

    lane = jax.lax.broadcasted_iota(jnp.int32, y.shape, 1)
    in_head = lane < action_dim
    # stable softmax over the action lanes only (padded lanes masked to -inf -> exp=0)
    logits = jnp.where(in_head, y, -jnp.inf)
    m = jnp.max(logits, axis=-1, keepdims=True)
    e = jnp.exp(logits - m)
    probs = e / jnp.sum(e, axis=-1, keepdims=True)

    # single lane-dense (TB, 128) store: probs in lanes <A, raw y (value / zeros) elsewhere
    out_ref[...] = jnp.where(in_head, probs, y)


def prepare_params(params, action_dim):
    """Pack raw (in,out)-layout params into 128-lane-padded, head-fused, stacked layout."""
    w1, b1, w2, b2, wa, ba, wv, bv = params
    obs_dim, hidden = w1.shape
    H = _round_up(hidden, LANE)
    assert action_dim + 1 <= LANE, "fused head assumes action_dim + 1 <= 128"

    w1p = jnp.zeros((obs_dim, H), jnp.float32).at[:, :hidden].set(w1)
    w2p = jnp.zeros((H, H), jnp.float32).at[:hidden, :hidden].set(w2)

    wh = jnp.concatenate([wa, wv], axis=1)   # (hidden, A+1)
    bh = jnp.concatenate([ba, bv], axis=1)   # (1, A+1)
    whp = jnp.zeros((H, H), jnp.float32).at[:hidden, :action_dim + 1].set(wh)

    # (2, H, H): [0] = shared_layer2, [1] = fused action/value head
    wstack = jnp.stack([w2p, whp], axis=0)

    # (3, H): [0] = b1, [1] = b2, [2] = fused head bias
    bstack = jnp.zeros((3, H), jnp.float32)
    bstack = bstack.at[0, :hidden].set(b1[0])
    bstack = bstack.at[1, :hidden].set(b2[0])
    bstack = bstack.at[2, :action_dim + 1].set(bh[0])
    return (w1p, wstack, bstack)


def policy_forward(state, packed_params, action_dim, *, block_batch=256):
    """state: (B, obs_dim) float32. Returns (action_prob (B, A), state_value (B, 1))."""
    w1p, wstack, bstack = packed_params
    B, obs_dim = state.shape
    H = w1p.shape[1]

    # batch tiling: small batches run as one tile (rounded to 8 sublanes),
    # large (vectorized-env) batches are split into 256-row parallel tiles.
    TB = min(block_batch, _round_up(B, 8))
    Bp = _round_up(B, TB)
    if Bp != B:
        state = jnp.pad(state.astype(jnp.float32), ((0, Bp - B), (0, 0)))
    else:
        state = state.astype(jnp.float32)

    kernel = functools.partial(policy_kernel, action_dim=action_dim)
    out = pl.pallas_call(
        kernel,
        out_shape=jax.ShapeDtypeStruct((Bp, H), jnp.float32),
        grid=(Bp // TB,),
        in_specs=[
            pl.BlockSpec((TB, obs_dim), lambda i: (i, 0)),    # state tiles over batch
            pl.BlockSpec((obs_dim, H), lambda i: (0, 0)),     # w1 replicated
            pl.BlockSpec((2, H, H), lambda i: (0, 0, 0)),     # layer2 + head weights
            pl.BlockSpec((3, H), lambda i: (0, 0)),           # all biases
        ],
        out_specs=pl.BlockSpec((TB, H), lambda i: (i, 0)),
        compiler_params=pltpu.CompilerParams(
            dimension_semantics=("parallel",)),
    )(state, w1p, wstack, bstack)

    action_prob = out[:B, :action_dim]
    state_value = out[:B, action_dim:action_dim + 1]
    return action_prob, state_value


def xavier_normal(key, fan_in, fan_out):
    # matches torch.nn.init.xavier_normal_ (gain=1.0), stored as (in, out)
    std = math.sqrt(2.0 / (fan_in + fan_out))
    return jax.random.normal(key, (fan_in, fan_out), dtype=jnp.float32) * std


def uniform_bias(key, fan_in, out):
    # matches PyTorch nn.Linear default bias init: U(-1/sqrt(fan_in), 1/sqrt(fan_in))
    bound = 1.0 / math.sqrt(fan_in)
    return jax.random.uniform(key, (1, out), dtype=jnp.float32,
                              minval=-bound, maxval=bound)


def init_params(key, obs_dim, hidden, action_dim):
    ks = jax.random.split(key, 8)
    w1 = xavier_normal(ks[0], obs_dim, hidden)
    b1 = uniform_bias(ks[1], obs_dim, hidden)
    w2 = xavier_normal(ks[2], hidden, hidden)
    b2 = uniform_bias(ks[3], hidden, hidden)
    wa = xavier_normal(ks[4], hidden, action_dim)
    ba = uniform_bias(ks[5], hidden, action_dim)
    wv = xavier_normal(ks[6], hidden, 1)
    bv = uniform_bias(ks[7], hidden, 1)
    return (w1, b1, w2, b2, wa, ba, wv, bv)


if __name__ == "__main__":
    key = jax.random.PRNGKey(0)
    k_param, k_state, k_big = jax.random.split(key, 3)

    # Small env-like shapes: obs_dim=8 (e.g. LunarLander), 4 discrete actions,
    # hidden=64 as in the module, batch of 2 states.
    batch, obs_dim, hidden, action_dim = 2, 8, 64, 4

    raw_params = init_params(k_param, obs_dim, hidden, action_dim)
    packed_params = prepare_params(raw_params, action_dim)
    state = jax.random.normal(k_state, (batch, obs_dim), dtype=jnp.float32)

    action_prob, state_value = policy_forward(state, packed_params, action_dim)
    action_prob = jax.block_until_ready(action_prob)
    state_value = jax.block_until_ready(state_value)

    # sanity checks against a plain-JAX reference of the same forward
    w1, b1, w2, b2, wa, ba, wv, bv = raw_params
    h1 = jnp.maximum(state @ w1 + b1, 0.0)
    h2 = jnp.maximum(h1 @ w2 + b2, 0.0)
    ref_prob = jax.nn.softmax(h2 @ wa + ba, axis=-1)
    ref_val = h2 @ wv + bv
    assert action_prob.shape == (batch, action_dim)
    assert state_value.shape == (batch, 1)
    assert jnp.allclose(action_prob, ref_prob, atol=1e-5)
    assert jnp.allclose(state_value, ref_val, atol=1e-5)
    assert jnp.allclose(jnp.sum(action_prob, axis=-1), 1.0, atol=1e-5)

    # larger (vectorized-env style) batch: exercises the batch grid / parallel axis
    big_state = jax.random.normal(k_big, (512, obs_dim), dtype=jnp.float32)
    big_prob, big_val = policy_forward(big_state, packed_params, action_dim)
    big_prob = jax.block_until_ready(big_prob)
    big_val = jax.block_until_ready(big_val)
    bh1 = jnp.maximum(big_state @ w1 + b1, 0.0)
    bh2 = jnp.maximum(bh1 @ w2 + b2, 0.0)
    assert jnp.allclose(big_prob, jax.nn.softmax(bh2 @ wa + ba, axis=-1), atol=1e-5)
    assert jnp.allclose(big_val, bh2 @ wv + bv, atol=1e-5)

    print("KERNEL_OK")
</pallas_src>

<mosaic_0001>
module attributes {stable_mosaic.version = 11 : i64} {
  func.func @policy_kernel(%arg0: i32, %arg1: memref<8x8xf32, #tpu.memory_space<vmem>>, %arg2: memref<8x128xf32, #tpu.memory_space<vmem>>, %arg3: memref<2x128x128xf32, #tpu.memory_space<vmem>>, %arg4: memref<3x128xf32, #tpu.memory_space<vmem>>, %arg5: memref<8x128xf32, #tpu.memory_space<vmem>>) attributes {dimension_semantics = [#tpu.dimension_semantics<parallel>], iteration_bounds = array<i64: 1>, scalar_prefetch = 0 : i64, scratch_operands = 0 : i64, tpu.core_type = #tpu.core_type<tc>, window_params = [{transform_indices = @transform_0, window_bounds = array<i64: 8, 8>}, {pipeline_mode = #tpu.pipeline_mode<synchronous>, transform_indices = @transform_1, window_bounds = array<i64: 8, 128>}, {pipeline_mode = #tpu.pipeline_mode<synchronous>, transform_indices = @transform_2, window_bounds = array<i64: 2, 128, 128>}, {pipeline_mode = #tpu.pipeline_mode<synchronous>, transform_indices = @transform_3, window_bounds = array<i64: 3, 128>}, {transform_indices = @transform_4, window_bounds = array<i64: 8, 128>}]} {
    %c0 = arith.constant 0 : index
    %c0_0 = arith.constant 0 : index
    %0 = vector.load %arg1[%c0, %c0_0] : memref<8x8xf32, #tpu.memory_space<vmem>>, vector<8x8xf32>
    %c0_1 = arith.constant 0 : index
    %c0_2 = arith.constant 0 : index
    %1 = vector.load %arg4[%c0_1, %c0_2] : memref<3x128xf32, #tpu.memory_space<vmem>>, vector<1x128xf32>
    %2 = vector.shape_cast %1 : vector<1x128xf32> to vector<128xf32>
    %c1 = arith.constant 1 : index
    %c0_3 = arith.constant 0 : index
    %3 = vector.load %arg4[%c1, %c0_3] : memref<3x128xf32, #tpu.memory_space<vmem>>, vector<1x128xf32>
    %4 = vector.shape_cast %3 : vector<1x128xf32> to vector<128xf32>
    %c2 = arith.constant 2 : index
    %c0_4 = arith.constant 0 : index
    %5 = vector.load %arg4[%c2, %c0_4] : memref<3x128xf32, #tpu.memory_space<vmem>>, vector<1x128xf32>
    %6 = vector.shape_cast %5 : vector<1x128xf32> to vector<128xf32>
    %c0_5 = arith.constant 0 : index
    %c0_6 = arith.constant 0 : index
    %7 = vector.load %arg2[%c0_5, %c0_6] : memref<8x128xf32, #tpu.memory_space<vmem>>, vector<8x128xf32>
    %cst = arith.constant dense<0.000000e+00> : vector<8x128xf32>
    %8 = tpu.matmul %0, %7, %cst {dimension_numbers = #tpu.dot_dimension_numbers<[1], [0], [0], [1], [0, 0, 1, 1], [], []>} : vector<8x8xf32>, vector<8x128xf32>, vector<8x128xf32> -> vector<8x128xf32>
    %9 = vector.shape_cast %2 : vector<128xf32> to vector<1x128xf32>
    %10 = vector.broadcast %9 : vector<1x128xf32> to vector<8x128xf32>
    %11 = arith.addf %8, %10 : vector<8x128xf32>
    %cst_7 = arith.constant 0.000000e+00 : f32
    %12 = vector.broadcast %cst_7 : f32 to vector<8x128xf32>
    %13 = arith.maximumf %11, %12 : vector<8x128xf32>
    %c0_8 = arith.constant 0 : index
    %c0_9 = arith.constant 0 : index
    %c0_10 = arith.constant 0 : index
    %14 = vector.load %arg3[%c0_8, %c0_9, %c0_10] : memref<2x128x128xf32, #tpu.memory_space<vmem>>, vector<1x128x128xf32>
    %15 = vector.shape_cast %14 : vector<1x128x128xf32> to vector<128x128xf32>
    %cst_11 = arith.constant dense<0.000000e+00> : vector<8x128xf32>
    %16 = tpu.matmul %13, %15, %cst_11 {dimension_numbers = #tpu.dot_dimension_numbers<[1], [0], [0], [1], [0, 0, 1, 1], [], []>} : vector<8x128xf32>, vector<128x128xf32>, vector<8x128xf32> -> vector<8x128xf32>
    %17 = vector.shape_cast %4 : vector<128xf32> to vector<1x128xf32>
    %18 = vector.broadcast %17 : vector<1x128xf32> to vector<8x128xf32>
    %19 = arith.addf %16, %18 : vector<8x128xf32>
    %cst_12 = arith.constant 0.000000e+00 : f32
    %20 = vector.broadcast %cst_12 : f32 to vector<8x128xf32>
    %21 = arith.maximumf %19, %20 : vector<8x128xf32>
    %c1_13 = arith.constant 1 : index
    %c0_14 = arith.constant 0 : index
    %c0_15 = arith.constant 0 : index
    %22 = vector.load %arg3[%c1_13, %c0_14, %c0_15] : memref<2x128x128xf32, #tpu.memory_space<vmem>>, vector<1x128x128xf32>
    %23 = vector.shape_cast %22 : vector<1x128x128xf32> to vector<128x128xf32>
    %cst_16 = arith.constant dense<0.000000e+00> : vector<8x128xf32>
    %24 = tpu.matmul %21, %23, %cst_16 {dimension_numbers = #tpu.dot_dimension_numbers<[1], [0], [0], [1], [0, 0, 1, 1], [], []>} : vector<8x128xf32>, vector<128x128xf32>, vector<8x128xf32> -> vector<8x128xf32>
    %25 = vector.shape_cast %6 : vector<128xf32> to vector<1x128xf32>
    %26 = vector.broadcast %25 : vector<1x128xf32> to vector<8x128xf32>
    %27 = arith.addf %24, %26 : vector<8x128xf32>
    %28 = tpu.iota {dimensions = array<i32: 1>} : vector<8x128xi32>
    %c4_i32 = arith.constant 4 : i32
    %29 = vector.broadcast %c4_i32 : i32 to vector<8x128xi32>
    %30 = arith.cmpi slt, %28, %29 : vector<8x128xi32>
    %cst_17 = arith.constant 0xFF800000 : f32
    %31 = vector.broadcast %cst_17 : f32 to vector<8x128xf32>
    %32 = arith.select %30, %27, %31 : vector<8x128xi1>, vector<8x128xf32>
    %cst_18 = arith.constant dense<0xFF800000> : vector<8xf32>
    %33 = vector.multi_reduction <maximumf>, %32, %cst_18 [1] : vector<8x128xf32> to vector<8xf32>
    %34 = vector.shape_cast %33 : vector<8xf32> to vector<8x1xf32>
    %35 = vector.broadcast %34 : vector<8x1xf32> to vector<8x128xf32>
    %36 = arith.subf %32, %35 : vector<8x128xf32>
    %37 = math.exp %36 : vector<8x128xf32>
    %cst_19 = arith.constant dense<0.000000e+00> : vector<8xf32>
    %38 = vector.multi_reduction <add>, %37, %cst_19 [1] : vector<8x128xf32> to vector<8xf32>
    %39 = vector.shape_cast %38 : vector<8xf32> to vector<8x1xf32>
    %40 = vector.broadcast %39 : vector<8x1xf32> to vector<8x128xf32>
    %41 = arith.divf %37, %40 : vector<8x128xf32>
    %42 = arith.select %30, %41, %27 : vector<8x128xi1>, vector<8x128xf32>
    %c0_20 = arith.constant 0 : index
    %c0_21 = arith.constant 0 : index
    %43 = vector.load %arg5[%c0_20, %c0_21] : memref<8x128xf32, #tpu.memory_space<vmem>>, vector<8x128xf32>
    tpu.vector_store %arg5[%c0_20, %c0_21], %42 {strides = array<i32>} : memref<8x128xf32, #tpu.memory_space<vmem>>, vector<8x128xf32>,
    return
  }
  func.func @transform_0(%arg0: i32) -> (i32, i32) {
    %c0_i32 = arith.constant 0 : i32
    %c0_i32_0 = arith.constant 0 : i32
    return %arg0, %c0_i32 : i32, i32
  }
  func.func @transform_1(%arg0: i32) -> (i32, i32) {
    %c0_i32 = arith.constant 0 : i32
    %c0_i32_0 = arith.constant 0 : i32
    %c0_i32_1 = arith.constant 0 : i32
    return %c0_i32, %c0_i32_0 : i32, i32
  }
  func.func @transform_2(%arg0: i32) -> (i32, i32, i32) {
    %c0_i32 = arith.constant 0 : i32
    %c0_i32_0 = arith.constant 0 : i32
    %c0_i32_1 = arith.constant 0 : i32
    %c0_i32_2 = arith.constant 0 : i32
    return %c0_i32, %c0_i32_0, %c0_i32_1 : i32, i32, i32
  }
  func.func @transform_3(%arg0: i32) -> (i32, i32) {
    %c0_i32 = arith.constant 0 : i32
    %c0_i32_0 = arith.constant 0 : i32
    %c0_i32_1 = arith.constant 0 : i32
    return %c0_i32, %c0_i32_0 : i32, i32
  }
  func.func @transform_4(%arg0: i32) -> (i32, i32) {
    %c0_i32 = arith.constant 0 : i32
    %c0_i32_0 = arith.constant 0 : i32
    return %arg0, %c0_i32 : i32, i32
  }
}

</mosaic_0001>

<bundles_post_ra>
// kernel: tpu_custom_call.1
= control target key start
LH: loop header
LB: loop body
LE: loop exit
PB: predicated region body
PF: predicated region fallthrough
CT: control target
= control target key end

     0   :  { %9 = vsyncpa [#allocation3], 0  ;;  %s421_s0 = inlined_call_operand.hbm [shape: f32[8,8], index: 0, kind: input, shape index: {}]   ;;  %s422_s1 = inlined_call_operand.hbm [shape: f32[8,128], index: 1, kind: input, shape index: {}]   ;;  %s423_s2 = inlined_call_operand.hbm [shape: f32[2,128,128], index: 2, kind: input, shape index: {}]   ;;  %s424_s3 = inlined_call_operand.hbm [shape: f32[3,128], index: 3, kind: input, shape index: {}]   ;;  %s425_s4 = inlined_call_operand.hbm [shape: f32[8,128], index: 4, kind: output, shape index: {}]  }
   0x1   :  { %10 = vsyncpa [#allocation6], 0 }
   0x2   :  { %11 = vsyncpa [#allocation9], 0  ;;  %s29_s17 = sshll.u32 %s422_s1, 4  ;;  %s30_s17 = int_to_ptr.hbm [resolvable:$true] %s29_s17 }
   0x3   :  { %12 = vsyncpa [#allocation4], 0  ;;  %s372_s18 = smov [#allocation5]   ;;  %s18_s22 = sshll.u32 %s421_s0, 4  ;;  %s19_s22 = int_to_ptr.hbm [resolvable:$true] %s18_s22 }
   0x4   :  { %s31_s19 = sshll.u32 %s372_s18, 4  ;;  %s373_s23 = smov [#allocation2]   ;;  %s32_s19 = int_to_ptr.vmem [resolvable:$true] %s31_s19 }
   0x5   :  { %34 = dma.hbm_to_vmem [thread:$0]  %s30_s17, 128, %s32_s19, [#allocation6]  }
   0x6   :  { %s20_s24 = sshll.u32 %s373_s23, 4  ;;  %s39_s27 = sshll.u32 %s423_s2, 4  ;;  %s21_s24 = int_to_ptr.vmem [resolvable:$true] %s20_s24  ;;  %s40_s27 = int_to_ptr.hbm [resolvable:$true] %s39_s27 }
   0x7   :  { %23 = dma.hbm_to_vmem [thread:$0]  %s19_s22, 128, %s21_s24, [#allocation3]  }
   0x8   :  { %s374_s1 = smov [#allocation7]   ;;  %s53_s5 = sshll.u32 %s424_s3, 4  ;;  %s54_s5 = int_to_ptr.hbm [resolvable:$true] %s53_s5 }
   0x9   :  { %s41_s28 = sshll.u32 %s374_s1, 4  ;;  %s375_s6 = smov 128   ;;  %s42_s28 = int_to_ptr.vmem [resolvable:$true] %s41_s28 }
   0xa   :  { %s376_s0 = smov 8   ;;  %s377_s7 = smov [#allocation8]  }
   0xb   :  { %47 = dma.hbm_to_vmem [thread:$0]  %s40_s27, 4096, %s42_s28, [#allocation6], %s375_s6, %s375_s6, %s376_s0  }
   0xc   :  { %s55_s8 = sshll.u32 %s377_s7, 4  ;;  %s56_s8 = int_to_ptr.vmem [resolvable:$true] %s55_s8 }
   0xd   :  { %58 = dma.hbm_to_vmem [thread:$0]  %s54_s5, 64, %s56_s8, [#allocation9]  }
   0xe   :  { %364 = dma.done.wait [#allocation3], 128  }
   0xf   :  { %365 = vsyncadd [#allocation3], 4294967168 }
  0x10   :  { %366 = dma.done.wait [#allocation6], 4224  }
  0x11   :  { %367 = vsyncadd [#allocation6], 4294963072 }
  0x12   :  { %368 = dma.done.wait [#allocation9], 64  }
  0x13   :  { %369 = vsyncadd [#allocation9], 4294967232  ;;  %vm81_vm0 = vcmask 64512   ;;  %v79_v0 = vld [vmem:[#allocation5] sm:$0xff]  ;;  %v75_v1 = vld [vmem:[#allocation2] sm:$0xff]  ;;  %v182_v42 = vlaneseq  ;;  %s378_s2 = smov [#allocation10]  }
  0x14   :  { %v121_v2 = vld [vmem:[#allocation7 + $0x78] sm:$0xff]  ;;  %100 = vmatpush.msra.mxu0 %v79_v0  ;;  %v120_v3 = vld [vmem:[#allocation7 + $0x70] sm:$0xff]  ;;  %v119_v4 = vld [vmem:[#allocation7 + $0x68] sm:$0xff]  ;;  %s215_s3 = sshll.u32 %s378_s2, 4  ;;  %s217_s11 = sshll.u32 %s425_s4, 4  ;;  %s216_s3 = int_to_ptr.vmem [resolvable:$true] %s215_s3  ;;  %s218_s11 = int_to_ptr.hbm [resolvable:$true] %s217_s11 }
  0x15   :  { %123 = vmatpush.msra.mxu1 %v121_v2  ;;  %229 = vmatmul.msk.f32.vlgmr.msra.gmra.mxu0 %vm81_vm0, %v75_v1  ;;  %v118_v5 = vld [vmem:[#allocation7 + $0x60] sm:$0xff]  ;;  %v117_v6 = vld [vmem:[#allocation7 + $0x58] sm:$0xff]  ;;  %v116_v7 = vld [vmem:[#allocation7 + $0x50] sm:$0xff]  ;;  %v183_v43 = vand.u32 127, %v182_v42 }
  0x16   :  { %v115_v8 = vld [vmem:[#allocation7 + $0x48] sm:$0xff]  ;;  %v114_v9 = vld [vmem:[#allocation7 + $0x40] sm:$0xff]  ;;  %v113_v10 = vld [vmem:[#allocation7 + $0x38] sm:$0xff] }
  0x17   :  { %124 = vmatpush.msra.mxu1 %v120_v3  ;;  %v112_v11 = vld [vmem:[#allocation7 + $0x30] sm:$0xff]  ;;  %v111_v12 = vld [vmem:[#allocation7 + $0x28] sm:$0xff]  ;;  %v110_v13 = vld [vmem:[#allocation7 + $0x20] sm:$0xff]  ;;  %vm184_vm1 = vcmp.lt.s32.totalorder %v183_v43, 4 }
  0x18   :  { %v109_v14 = vld [vmem:[#allocation7 + $0x18] sm:$0xff]  ;;  %v108_v15 = vld [vmem:[#allocation7 + $0x10] sm:$0xff]  ;;  %v107_v16 = vld [vmem:[#allocation7 + $0x8] sm:$0xff] }
  0x19   :  { %125 = vmatpush.msra.mxu1 %v119_v4  ;;  %v106_v17 = vld [vmem:[#allocation7] sm:$0xff]  ;;  %v160_v18 = vld [vmem:[#allocation7 + $0xf8] sm:$0xff]  ;;  %v159_v19 = vld [vmem:[#allocation7 + $0xf0] sm:$0xff] }
  0x1a   :  { %162 = vmatpush.msra.mxu2 %v160_v18  ;;  %v158_v20 = vld [vmem:[#allocation7 + $0xe8] sm:$0xff]  ;;  %v157_v21 = vld [vmem:[#allocation7 + $0xe0] sm:$0xff]  ;;  %v156_v22 = vld [vmem:[#allocation7 + $0xd8] sm:$0xff] }
  0x1b   :  { %126 = vmatpush.msra.mxu1 %v118_v5  ;;  %v155_v23 = vld [vmem:[#allocation7 + $0xd0] sm:$0xff]  ;;  %v154_v24 = vld [vmem:[#allocation7 + $0xc8] sm:$0xff]  ;;  %v153_v25 = vld [vmem:[#allocation7 + $0xc0] sm:$0xff] }
  0x1c   :  { %163 = vmatpush.msra.mxu2 %v159_v19  ;;  %v152_v26 = vld [vmem:[#allocation7 + $0xb8] sm:$0xff]  ;;  %v151_v27 = vld [vmem:[#allocation7 + $0xb0] sm:$0xff]  ;;  %v150_v28 = vld [vmem:[#allocation7 + $0xa8] sm:$0xff] }
  0x1d   :  { %127 = vmatpush.msra.mxu1 %v117_v6  ;;  %v149_v29 = vld [vmem:[#allocation7 + $0xa0] sm:$0xff]  ;;  %v148_v30 = vld [vmem:[#allocation7 + $0x98] sm:$0xff]  ;;  %v147_v35 = vld [vmem:[#allocation7 + $0x90] sm:$0xff] }
  0x1e   :  { %164 = vmatpush.msra.mxu2 %v158_v20  ;;  %v237_v31 = vld [vmem:[#allocation8] ss:$0 sm:$0xff]  ;;  %v146_v36 = vld [vmem:[#allocation7 + $0x88] sm:$0xff]  ;;  %v238_v38 = vld [vmem:[#allocation8 + $0x1] ss:$0 sm:$0xff] }
  0x1f   :  { %128 = vmatpush.msra.mxu1 %v116_v7  ;;  %v145_v37 = vld [vmem:[#allocation7 + $0x80] sm:$0xff] }
  0x20   :  { %165 = vmatpush.msra.mxu2 %v157_v21  ;;  %v239_v44 = vld [vmem:[#allocation8 + $0x2] ss:$0 sm:$0xff] }
  0x21   :  { %129 = vmatpush.msra.mxu1 %v115_v8 }
  0x22   :  { %166 = vmatpush.msra.mxu2 %v156_v22 }
  0x23   :  { %130 = vmatpush.msra.mxu1 %v114_v9 }
  0x24   :  { %167 = vmatpush.msra.mxu2 %v155_v23 }
  0x25   :  { %131 = vmatpush.msra.mxu1 %v113_v10 }
  0x26   :  { %168 = vmatpush.msra.mxu2 %v154_v24 }
  0x27   :  { %132 = vmatpush.msra.mxu1 %v112_v11 }
  0x28   :  { %169 = vmatpush.msra.mxu2 %v153_v25 }
  0x29   :  { %133 = vmatpush.msra.mxu1 %v111_v12 }
  0x2a   :  { %170 = vmatpush.msra.mxu2 %v152_v26 }
  0x2b   :  { %134 = vmatpush.msra.mxu1 %v110_v13 }
  0x2c   :  { %171 = vmatpush.msra.mxu2 %v151_v27 }
  0x2d   :  { %135 = vmatpush.msra.mxu1 %v109_v14 }
  0x2e   :  { %172 = vmatpush.msra.mxu2 %v150_v28 }
  0x2f   :  { %136 = vmatpush.msra.mxu1 %v108_v15 }
  0x30   :  { %173 = vmatpush.msra.mxu2 %v149_v29 }
  0x31   :  { %137 = vmatpush.msra.mxu1 %v107_v16 }
  0x32   :  { %174 = vmatpush.msra.mxu2 %v148_v30 }
  0x33   :  { %138 = vmatpush.msra.mxu1 %v106_v17 }
  0x34   :  { %175 = vmatpush.msra.mxu2 %v147_v35 }
  0x36   :  { %176 = vmatpush.msra.mxu2 %v146_v36 }
  0x38   :  { %177 = vmatpush.msra.mxu2 %v145_v37 }
  0x92   :  { %v102_v32 = vpop.f32.mrf.mxu0 }
  0x93   :  { %v103_v33 = vadd.f32 %v237_v31, %v102_v32 }
  0x95   :  { %v105_v34 = vmax.f32 %v103_v33, 0.0 }
  0x97   :  { %139 = vmatmul.f32.vlgmr.msra.gmra.mxu1 %v105_v34 }
 0x114   :  { %v140_v39 = vpop.f32.mrf.mxu1 }
 0x115   :  { %v141_v40 = vadd.f32 %v238_v38, %v140_v39 }
 0x117   :  { %v143_v41 = vmax.f32 %v141_v40, 0.0 }
 0x119   :  { %178 = vmatmul.f32.vlgmr.msra.gmra.mxu2 %v143_v41 }
 0x19c   :  { %v179_v45 = vpop.f32.mrf.mxu2 }
 0x19d   :  { %v180_v46 = vadd.f32 %v239_v44, %v179_v45 }
 0x19f   :  { %v185_v47 = vsel %vm184_vm1, %v180_v46, -inf }
 0x1a0   :  { %186 = vmax.xlane.f32.xlu0 %v185_v47 }
 0x213   :  { %v187_v48 = vpop.xlane.xlu0 %186 }
 0x214   :  { %v188_v49 = vsub.f32 %v185_v47, %v187_v48 }
 0x216   :  { %v189_v50 = vmul.f32 1.442695, %v188_v49 }
 0x218   :  { %240 = vpow2.f32 %v189_v50 }
 0x21e   :  { %v241_v51 = vpop.eup %240 }
 0x21f   :  { %191 = vadd.xlane.f32.xlu0 %v241_v51 }
 0x292   :  { %v192_v52 = vpop.xlane.xlu0 %191 }
 0x293   :  { %242 = vrcp.f32 %v192_v52  ;;  %v204_v56 = vand.u32 2147483648, %v192_v52  ;;  %v202_v58 = vand.u32 2147483647, %v192_v52  ;;  %vm198_vm3 = vweird.f32 %v192_v52 }
 0x295   :  { %v205_v60 = vor.u32 1.1754944e-38, %v204_v56  ;;  %vm203_vm5 = vcmp.eq.f32.partialorder %v202_v58, 8.507059e+37 }
 0x299   :  { %v243_v53 = vpop.eup %242 }
 0x29a   :  { %v194_v54 = vmul.f32 %v243_v53, %v192_v52  ;;  %vm199_vm2 = vweird.f32 %v243_v53 }
 0x29b   :  { %vm200_vm4 = vmor %vm198_vm3, %vm199_vm2 }
 0x29c   :  { %v195_v55 = vsub.f32 1.0, %v194_v54 }
 0x29e   :  { %v196_v57 = vmul.f32 %v243_v53, %v195_v55 }
 0x2a0   :  { %v197_v59 = vadd.f32 %v243_v53, %v196_v57 }
 0x2a2   :  { %v201_v61 = vsel %vm200_vm4, %v243_v53, %v197_v59 }
 0x2a3   :  { %v206_v62 = vsel %vm203_vm5, %v205_v60, %v201_v61 }
 0x2a4   :  { %v207_v63 = vmul.f32 %v241_v51, %v206_v62 }
 0x2a6   :  { %v208_v0 = vsel %vm184_vm1, %v207_v63, %v180_v46 }
 0x2a7   :  { %209 = vst [vmem:[#allocation10] sm:$0xff] %v208_v0 }
 0x2a8   :  { %220 = dma.vmem_to_hbm [thread:$0]  %s216_s3, 128, %s218_s11, [#allocation4]  }
 0x2a9   :  { %370 = dma.done.wait [#allocation4], 128  }
 0x2aa   :  { %371 = vsyncadd [#allocation4], 4294967168 }
 0x2ab   :  { %225 = vsyncpa [#allocation3], 1 }
 0x2ac   :  { %226 = vsyncpa [#allocation6], 1 }
 0x2ad   :  { %227 = vsyncpa [#allocation9], 1 }
 0x2ae   :  { %228 = vsyncpa [#allocation4], 1 }

</bundles_post_ra>
